<compile_context>
chip_gen: v6e
topology: v6e:2x2x1
jax: 0.10.0
libtpu: 0.0.40
codegen_flags: <defaults>
</compile_context>

<pallas_src>
import math

import jax
import jax.numpy as jnp
from jax.experimental import pallas as pl
from jax.experimental.pallas import tpu as pltpu


def _round_up(x, m):
    return ((x + m - 1) // m) * m


def _gcn_kernel_ax(a_ref, x_ref, w_ref, bias_ref, o_ref):
    # (A_tile @ X[b]) @ W   -- used when C_pad <= Cp_pad.
    # a_ref: (TM, N_pad), x_ref: (N_pad, C_pad), w_ref: (C_pad, Cp_pad),
    # bias_ref: (1, Cp_pad), o_ref: (TM, Cp_pad)
    ax = jnp.dot(a_ref[...], x_ref[...], preferred_element_type=jnp.float32)
    out = jnp.dot(ax, w_ref[...], preferred_element_type=jnp.float32)
    o_ref[...] = (out + bias_ref[...]).astype(o_ref.dtype)


def _gcn_kernel_xw(a_ref, x_ref, w_ref, bias_ref, o_ref, support_ref):
    # A_tile @ (X[b] @ W)   -- used when Cp_pad < C_pad.
    # The per-batch support is computed once (at row-tile 0) into a resident
    # VMEM scratch and reused across all row tiles of that batch element.
    @pl.when(pl.program_id(1) == 0)
    def _():
        support_ref[...] = jnp.dot(x_ref[...], w_ref[...],
                                   preferred_element_type=jnp.float32)

    out = jnp.dot(a_ref[...], support_ref[...],
                  preferred_element_type=jnp.float32)
    o_ref[...] = (out + bias_ref[...]).astype(o_ref.dtype)


def gcn_forward(X, A, W, bias):
    B, N, C = X.shape
    Cp = W.shape[1]
    dtype = X.dtype

    # ---- TPU-friendly padded shapes -------------------------------------
    C_pad = _round_up(C, 128)     # lane dim of X / rows of W
    Cp_pad = _round_up(Cp, 128)   # lane dim of output / cols of W / bias

    # Row tile of A / output: multiple of 8, capped so the double-buffered
    # f32 A tile stays under ~16 MiB (safe for v7x's smaller VMEM).
    tm = min(512, _round_up(N, 8))
    while tm > 8 and 2 * tm * _round_up(N, tm) * 4 > 16 * 1024 * 1024:
        tm //= 2
    N_pad = _round_up(N, tm)
    num_row_tiles = N_pad // tm

    # Zero padding is exact: padded rows/cols contribute nothing and padded
    # output rows/cols are sliced away below.
    X_p = jnp.pad(X, ((0, 0), (0, N_pad - N), (0, C_pad - C)))
    A_p = jnp.pad(A, ((0, N_pad - N), (0, N_pad - N)))
    W_p = jnp.pad(W, ((0, C_pad - C), (0, Cp_pad - Cp)))
    bias_p = jnp.pad(bias.reshape(1, Cp), ((0, 0), (0, Cp_pad - Cp)))

    use_ax = C_pad <= Cp_pad
    kernel = _gcn_kernel_ax if use_ax else _gcn_kernel_xw
    scratch = [] if use_ax else [pltpu.VMEM((N_pad, Cp_pad), jnp.float32)]
    semantics = ("parallel", "parallel") if use_ax else ("parallel", "arbitrary")

    # Rough double-buffered VMEM estimate; only raise the scoped limit when
    # the default (~32 MiB) would not be enough.
    est_bytes = 4 * (2 * tm * N_pad          # A row tile
                     + 2 * N_pad * C_pad     # X[b]
                     + 2 * C_pad * Cp_pad    # W
                     + 2 * Cp_pad            # bias
                     + 2 * tm * Cp_pad       # output tile
                     + (0 if use_ax else N_pad * Cp_pad))  # support scratch
    vmem_limit = None
    if est_bytes > 30 * 1024 * 1024:
        vmem_limit = min(int(est_bytes * 1.25), 64 * 1024 * 1024)

    out_padded = pl.pallas_call(
        kernel,
        out_shape=jax.ShapeDtypeStruct((B, N_pad, Cp_pad), dtype),
        grid_spec=pltpu.PrefetchScalarGridSpec(
            num_scalar_prefetch=0,
            grid=(B, num_row_tiles),
            in_specs=[
                pl.BlockSpec((tm, N_pad), lambda b, i: (i, 0)),            # A rows
                pl.BlockSpec((None, N_pad, C_pad), lambda b, i: (b, 0, 0)),  # X[b]
                pl.BlockSpec((C_pad, Cp_pad), lambda b, i: (0, 0)),        # W
                pl.BlockSpec((1, Cp_pad), lambda b, i: (0, 0)),            # bias
            ],
            out_specs=pl.BlockSpec((None, tm, Cp_pad), lambda b, i: (b, i, 0)),
            scratch_shapes=scratch,
        ),
        compiler_params=pltpu.CompilerParams(
            dimension_semantics=semantics,
            vmem_limit_bytes=vmem_limit,
        ),
    )(A_p, X_p, W_p, bias_p)

    return out_padded[:, :N, :Cp]


if __name__ == "__main__":
    # Small shapes consistent with the module: X (B, N, C), A (N, N).
    B, N = 2, 16
    in_features, out_features = 8, 32

    key = jax.random.PRNGKey(0)
    kx, ka, kw, kb = jax.random.split(key, 4)

    X = jax.random.normal(kx, (B, N, in_features), dtype=jnp.float32)
    A = jax.random.normal(ka, (N, N), dtype=jnp.float32)

    # Deterministic parameter init mirroring reset_parameters():
    # uniform(-stvd, stvd) with stvd = 1/sqrt(out_features)
    stvd = 1.0 / math.sqrt(out_features)
    W = jax.random.uniform(kw, (in_features, out_features),
                           minval=-stvd, maxval=stvd, dtype=jnp.float32)
    bias = jax.random.uniform(kb, (out_features,),
                              minval=-stvd, maxval=stvd, dtype=jnp.float32)

    out = gcn_forward(X, A, W, bias)
    out = jax.block_until_ready(out)

    # Reference: same math as the torch.matmul path (A @ (X @ W) + bias).
    ref = jnp.matmul(A, jnp.matmul(X, W)) + bias
    assert out.shape == (B, N, out_features)
    assert jnp.allclose(out, ref, atol=1e-4, rtol=1e-4), \
        float(jnp.max(jnp.abs(out - ref)))

    print("KERNEL_OK")
</pallas_src>

<mosaic_0001>
module attributes {stable_mosaic.version = 11 : i64} {
  func.func @_gcn_kernel_ax(%arg0: i32, %arg1: i32, %arg2: memref<16x16xf32, #tpu.memory_space<vmem>>, %arg3: memref<1x16x128xf32, #tpu.memory_space<vmem>>, %arg4: memref<128x128xf32, #tpu.memory_space<vmem>>, %arg5: memref<1x128xf32, #tpu.memory_space<vmem>>, %arg6: memref<1x16x128xf32, #tpu.memory_space<vmem>>) attributes {dimension_semantics = [#tpu.dimension_semantics<parallel>, #tpu.dimension_semantics<parallel>], iteration_bounds = array<i64: 2, 1>, scalar_prefetch = 0 : i64, scratch_operands = 0 : i64, tpu.core_type = #tpu.core_type<tc>, window_params = [{transform_indices = @transform_0, window_bounds = array<i64: 16, 16>}, {transform_indices = @transform_1, window_bounds = array<i64: 1, 16, 128>}, {pipeline_mode = #tpu.pipeline_mode<synchronous>, transform_indices = @transform_2, window_bounds = array<i64: 128, 128>}, {pipeline_mode = #tpu.pipeline_mode<synchronous>, transform_indices = @transform_3, window_bounds = array<i64: 1, 128>}, {transform_indices = @transform_4, window_bounds = array<i64: 1, 16, 128>}]} {
    %c0 = arith.constant 0 : index
    %c0_0 = arith.constant 0 : index
    %0 = vector.load %arg2[%c0, %c0_0] : memref<16x16xf32, #tpu.memory_space<vmem>>, vector<16x16xf32>
    %c0_1 = arith.constant 0 : index
    %c0_2 = arith.constant 0 : index
    %c0_3 = arith.constant 0 : index
    %1 = vector.load %arg3[%c0_1, %c0_2, %c0_3] : memref<1x16x128xf32, #tpu.memory_space<vmem>>, vector<1x16x128xf32>
    %2 = vector.shape_cast %1 : vector<1x16x128xf32> to vector<16x128xf32>
    %cst = arith.constant dense<0.000000e+00> : vector<16x128xf32>
    %3 = tpu.matmul %0, %2, %cst {dimension_numbers = #tpu.dot_dimension_numbers<[1], [0], [0], [1], [0, 0, 1, 1], [], []>} : vector<16x16xf32>, vector<16x128xf32>, vector<16x128xf32> -> vector<16x128xf32>
    %c0_4 = arith.constant 0 : index
    %c0_5 = arith.constant 0 : index
    %4 = vector.load %arg4[%c0_4, %c0_5] : memref<128x128xf32, #tpu.memory_space<vmem>>, vector<128x128xf32>
    %cst_6 = arith.constant dense<0.000000e+00> : vector<16x128xf32>
    %5 = tpu.matmul %3, %4, %cst_6 {dimension_numbers = #tpu.dot_dimension_numbers<[1], [0], [0], [1], [0, 0, 1, 1], [], []>} : vector<16x128xf32>, vector<128x128xf32>, vector<16x128xf32> -> vector<16x128xf32>
    %c0_7 = arith.constant 0 : index
    %c0_8 = arith.constant 0 : index
    %6 = vector.load %arg5[%c0_7, %c0_8] : memref<1x128xf32, #tpu.memory_space<vmem>>, vector<1x128xf32>
    %7 = vector.broadcast %6 : vector<1x128xf32> to vector<16x128xf32>
    %8 = arith.addf %5, %7 : vector<16x128xf32>
    %c0_9 = arith.constant 0 : index
    %c0_10 = arith.constant 0 : index
    %c0_11 = arith.constant 0 : index
    %9 = vector.load %arg6[%c0_9, %c0_10, %c0_11] : memref<1x16x128xf32, #tpu.memory_space<vmem>>, vector<1x16x128xf32>
    %10 = vector.shape_cast %9 : vector<1x16x128xf32> to vector<16x128xf32>
    %11 = vector.shape_cast %8 : vector<16x128xf32> to vector<1x16x128xf32>
    tpu.vector_store %arg6[%c0_9, %c0_10, %c0_11], %11 {strides = array<i32>} : memref<1x16x128xf32, #tpu.memory_space<vmem>>, vector<1x16x128xf32>,
    return
  }
  func.func @transform_0(%arg0: i32, %arg1: i32) -> (i32, i32) {
    %c0_i32 = arith.constant 0 : i32
    %c0_i32_0 = arith.constant 0 : i32
    return %arg1, %c0_i32 : i32, i32
  }
  func.func @transform_1(%arg0: i32, %arg1: i32) -> (i32, i32, i32) {
    %c0_i32 = arith.constant 0 : i32
    %c0_i32_0 = arith.constant 0 : i32
    %c0_i32_1 = arith.constant 0 : i32
    return %arg0, %c0_i32, %c0_i32_0 : i32, i32, i32
  }
  func.func @transform_2(%arg0: i32, %arg1: i32) -> (i32, i32) {
    %c0_i32 = arith.constant 0 : i32
    %c0_i32_0 = arith.constant 0 : i32
    %c0_i32_1 = arith.constant 0 : i32
    return %c0_i32, %c0_i32_0 : i32, i32
  }
  func.func @transform_3(%arg0: i32, %arg1: i32) -> (i32, i32) {
    %c0_i32 = arith.constant 0 : i32
    %c0_i32_0 = arith.constant 0 : i32
    %c0_i32_1 = arith.constant 0 : i32
    return %c0_i32, %c0_i32_0 : i32, i32
  }
  func.func @transform_4(%arg0: i32, %arg1: i32) -> (i32, i32, i32) {
    %c0_i32 = arith.constant 0 : i32
    %c0_i32_0 = arith.constant 0 : i32
    return %arg0, %arg1, %c0_i32 : i32, i32, i32
  }
}

</mosaic_0001>

<bundles_post_ra>
// kernel: tpu_custom_call.1
= control target key start
LH: loop header
LB: loop body
LE: loop exit
PB: predicated region body
PF: predicated region fallthrough
CT: control target
= control target key end

     0   :  { %s1166_s0 = inlined_call_operand.hbm [shape: f32[16,16], index: 0, kind: input, shape index: {}]   ;;  %s1167_s1 = inlined_call_operand.hbm [shape: f32[2,16,128], index: 1, kind: input, shape index: {}]   ;;  %s1168_s2 = inlined_call_operand.hbm [shape: f32[128,128], index: 2, kind: input, shape index: {}]   ;;  %s1169_s3 = inlined_call_operand.vmem [shape: f32[1,128], index: 3, kind: input, shape index: {}]   ;;  %s1170_s4 = inlined_call_operand.hbm [shape: f32[2,16,128], index: 4, kind: output, shape index: {}]  }
   0x1   :  { %1177 = sst [smem:[#allocation14_spill]] %s1166_s0 }
   0x2   :  { %1178 = sst [smem:[#allocation15_spill]] %s1168_s2 }
   0x3   :  { %9 = vsyncpa [#allocation3], 0 }
   0x4   :  { %10 = vsyncpa [#allocation6], 0 }
   0x5   :  { %12 = vsyncpa [#allocation6 + $0x1], 0 }
   0x6   :  { %13 = vsyncpa [#allocation4], 0 }
   0x7   :  { %15 = vsyncpa [#allocation4 + $0x1], 0  ;;  %s956_s15 = smov 0   ;;  %s958_s16 = smov 0  }
   0x8   :  { %s960_s17 = smov 0   ;;  %s962_s18 = smov 0  }
   0x9   :  { %s964_s19 = smov 0   ;;  %s966_s20 = smov 0  }
   0xa LB: > { %1179 = sst [smem:[#allocation13_spill]] %s921_s20  ;;  %s987_s21 = sadd.s32 4294967295, %s921_s20   ;;  %s921_s20 = sphi %s966_s20, %s21_s20   ;;  %s917_s19 = sphi %s964_s19, %s1203_s19   ;;  %s913_s18 = sphi %s962_s18, %s1202_s18   ;;  %s909_s17 = sphi %s960_s17, %s1201_s17   ;;  %s905_s16 = sphi %s958_s16, %s1200_s16   ;;  %s901_s15 = sphi %s956_s15, %s1199_s15  }
   0xb   : > { %s579_s22 = sadd.s32 4294967294, %s921_s20   ;;  %p73_p0 = scmp.ne.s32.totalorder %s909_s17, %s905_s16 }
   0xc   : > { %p74_p1 = scmp.eq.s32.totalorder %s921_s20, 0  ;;  %p79_p2 = scmp.ne.s32.totalorder %s905_s16, %s901_s15 }
   0xd   : > { %p1171_p3 = scmp.eq.s32.totalorder %s987_s21, 0  ;;  %p147_p5 = scmp.eq.s32.totalorder %s987_s21, 1 }
   0xe   : > { %p996_p4 = por %p74_p1, %p73_p0  ;;  %p153_p7 = scmp.eq.s32.totalorder %s579_s22, 1 }
   0xf   : > { %p1003_p6 = por %p1171_p3, %p79_p2  ;;  %p1007_p8 = por %p147_p5, %p73_p0 }
  0x10   : > { %p580_p9 = scmp.ge.s32.totalorder %s921_s20, 1  ;;  %p1012_p10 = por %p153_p7, %p79_p2 }
  0x11   : > { %s1182_s25 = scalar_select %p1007_p8, 1, 0 }
  0x12   : > { %s1183_s26 = scalar_select %p1012_p10, 1, 0 }
  0x13   : > { %p160_p11 = scmp.lt.s32.totalorder %s921_s20, 3  ;;  %s923_s28 = smov [#allocation7]  }
  0x14   : > { %s188_s29 = sshll.u32 %s923_s28, 4  ;;  %p695_p0 = scmp.lt.s32.totalorder %s921_s20, 2  ;;  %s189_s29 = int_to_ptr.vmem [resolvable:$true] %s188_s29 }
  0x15   : > { %p1017_p12 = pnand %p580_p9, %p160_p11  ;;  %s764_s6 = scalar_lea.vmem %s189_s29, 2048 }
  0x16   : > { %p1033_p2 = pnand %p695_p0, %p996_p4  ;;  %p765_p9 = scmp.ne.s32.totalorder %s189_s29, %s764_s6 }
  0x17   : > { %p678_p1 = pneg %p1017_p12  ;;  %p772_p10 = scmp.lt.s32.totalorder %s189_s29, %s189_s29 }
  0x19   : > { %p1027_p5 = pnand %p678_p1, %p1171_p3  ;;  %p773_p1 = scmp.lt.s32.totalorder %s764_s6, %s764_s6 }
  0x1b   : > { %p755_p7 = pneg %p1027_p5  ;;  %p774_p3 = por %p773_p1, %p772_p10 }
  0x1d   : > { %p767_p11 = pnand %p765_p9, %p755_p7 }
  0x1f   : > { %p768_p13 = pneg %p767_p11 }
  0x21   : > { %p775_p8 = pnand %p774_p3, %p768_p13 }
  0x23   : > { %778 = shalt.err (!%p775_p8)
}
  0x24   : > { %s1173_s7 = smov 128   ;;  %s1174_s8 = smov 8  }
  0x25   : > { %s1187_s2 = sld [smem:[#allocation15_spill]]  ;;  %s926_s11 = smov [#allocation2]  }
  0x26   : > { %s175_s12 = sshll.u32 %s926_s11, 4  ;;  %s176_s12 = int_to_ptr.vmem [resolvable:$true] %s175_s12 }
  0x27   : > { %s790_s13 = scalar_lea.vmem %s176_s12, 256  ;;  %p798_p10 = scmp.lt.s32.totalorder %s176_s12, %s176_s12 }
  0x28   : > { %p791_p4 = scmp.ne.s32.totalorder %s176_s12, %s790_s13  ;;  %p799_p13 = scmp.lt.s32.totalorder %s790_s13, %s790_s13 }
  0x2a   : > { %p793_p3 = pnand %p791_p4, %p755_p7  ;;  %p800_p0 = por %p799_p13, %p798_p10 }
  0x2b   : > { %684 = dma.hbm_to_vmem [thread:$0]  (!%p1027_p5), %s1187_s2, 2048, %s189_s29, [#allocation6], %s1173_s7, %s1173_s7, %s1174_s8  }
  0x2c   : > { %p794_p8 = pneg %p793_p3 }
  0x2e   : > { %p801_p9 = pnand %p800_p0, %p794_p8 }
  0x30   : > { %804 = shalt.err (!%p801_p9)
}
  0x31   : > { %s1188_s0 = sld [smem:[#allocation14_spill]]  ;;  %s66_s23 = sadd.s32 1, %s909_s17 }
  0x32   : > { %s33_s28 = sadd.s32 1, %s917_s19  ;;  %s205_s29 = sand.u32 1, %s921_s20  }
  0x33   : > { %p35_p7 = scmp.ge.s32.totalorder %s33_s28, 2  ;;  %s207_s30 = sand.u32 1, %s909_s17  }
  0x34   : > { %s600_s6 = sshll.u32 %s917_s19, 8  ;;  %s584_s9 = sshll.u32 %s207_s30, 4 }
  0x35   : > { %s1205_s28 = smov (%p35_p7, %s33_s28), 0  ;;  %s215_s13 = scalar_lea.hbm %s1167_s1, %s600_s6 }
  0x36   : > { %s63_s14 = ssub.s32 %s917_s19, %s1205_s28  ;;  %s209_s22 = scalar_lea.vmem [#allocation5], %s584_s9 }
  0x37   : > { %681 = dma.hbm_to_vmem [thread:$0]  (!%p1027_p5), %s1188_s0, 256, %s176_s12, [#allocation3], %s1173_s7, %s1173_s7, %s1174_s8  }
  0x38   : > { %p64_p11 = scmp.eq.s32.totalorder %s63_s14, 0  ;;  %s216_s2 = sshll.u32 %s209_s22, 4  ;;  %s217_s2 = int_to_ptr.vmem [resolvable:$true] %s216_s2 }
  0x39   : > { %s206_s7 = scalar_lea.sflag [#allocation6], %s205_s29  ;;  %p807_p5 = pneg %p1033_p2 }
  0x3a   : > { %s1074_s12 = scalar_select %p64_p11, %s909_s17, %s66_s23  }
  0x3b   : > { %s818_s8 = scalar_lea.vmem %s217_s2, 256  ;;  %s927_s0 = smov [#allocation5]  }
  0x3c   : > { %p819_p1 = scmp.ne.s32.totalorder %s217_s2, %s818_s8  ;;  %s823_s30 = sshll.u32 %s927_s0, 4  ;;  %s824_s30 = int_to_ptr.vmem [resolvable:$false] %s823_s30 }
  0x3d   : > { %s825_s20 = scalar_lea.vmem %s824_s30, 512  ;;  %p826_p8 = scmp.lt.s32.totalorder %s217_s2, %s824_s30 }
  0x3e   : > { %p821_p4 = pnand %p819_p1, %p807_p5  ;;  %p827_p10 = scmp.lt.s32.totalorder %s825_s20, %s818_s8 }
  0x40   : > { %p822_p3 = pneg %p821_p4  ;;  %p828_p13 = por %p827_p10, %p826_p8 }
  0x42   : > { %p829_p0 = pnand %p828_p13, %p822_p3 }
  0x44   : > { %832 = shalt.err (!%p829_p0)
}
  0x45   : > { %s1189_s23 = smov 8   ;;  %s1190_s6 = smov 128  }
  0x46   : > { %688 = dma.hbm_to_vmem [thread:$0]  (!%p1033_p2), %s215_s13, 256, %s217_s2, %s206_s7, %s1190_s6, %s1190_s6, %s1189_s23  }
  0x47   : > { %228 = sbr.rel (%p1017_p12) target bundleno = 496 (0x1f0), region = 36  ;;  %p1191_p9 = scmp.eq.s32.totalorder (!%p1017_p12), %s987_s21, 0 }
  0x4c   : > { %884 = dma.done.wait (%p1191_p9), [#allocation3], 256   ;;  %p1192_p7 = pmov %p1191_p9 }
  0x4d   : > { %s234_s0 = sand.u32 1, %s987_s21   ;;  %s236_s20 = sand.u32 1, %s905_s16  }
  0x4e   : > { %886 = vsyncadd (%p1192_p7), [#allocation3], 4294967040  ;;  %s1093_s5 = sshll.u32 %s236_s20, 4  ;;  %s235_s2 = scalar_lea.sflag [#allocation6], %s234_s0 }
  0x4f   : > { %s238_s7 = scalar_lea.vmem [#allocation5], %s1093_s5 }
  0x50   : > { %888 = dma.done.wait (%p1003_p6), %s235_s2, 256  }
  0x51   : > { %890 = vsyncadd (%p1003_p6), %s235_s2, 4294967040  ;;  %p1193_p12 = pmov %p1192_p7 }
  0x52   : > { %p1194_p2 = pmov %p1192_p7 }
  0x53   : > { %892 = dma.done.wait (%p1193_p12), [#allocation6], 2048  }
  0x54   : > { %894 = vsyncadd (%p1194_p2), [#allocation6], 4294965248  ;;  %vm273_vm0 = vcmask 130048   ;;  %v272_v0 = vld [vmem:[%s238_s7 + $0x8] sm:$0xff]  ;;  %v271_v1 = vld [vmem:[%s238_s7] sm:$0xff]  ;;  %s266_s27 = scalar_lea.vmem [#allocation8], %s1093_s5 }
  0x55   : > { %v269_v2 = vld [vmem:[#allocation2] sm:$0xff]  ;;  %624 = vmatprep.subr.mxu0 %v272_v0  ;;  %v370_v3 = vld [vmem:[#allocation7 + $0x78] sm:$0xff]  ;;  %v368_v6 = vld [vmem:[#allocation7 + $0x68] sm:$0xff]  ;;  %s471_s8 = sshll.u32 %s266_s27, 4  ;;  %s601_s29 = sshll.u32 %s913_s18, 8  ;;  %s1111_s8 = int_to_ptr.vmem [resolvable:$true] %s471_s8 }
  0x56   : > { %628 = vmatprep.mubr.msk.f32.mxu0 %vm273_vm0, %v269_v2  ;;  %v369_v4 = vld [vmem:[#allocation7 + $0x70] sm:$0xff]  ;;  %625 = vmatpush3.msra.mxu0 %v272_v0  ;;  %v270_v5 = vld [vmem:[#allocation2 + $0x8] sm:$0xff]  ;;  %v367_v7 = vld [vmem:[#allocation7 + $0x60] sm:$0xff]  ;;  %s1116_s11 = scalar_lea.hbm %s1170_s4, %s601_s29  ;;  %s1120_s13 = scalar_lea.sflag [#allocation4], %s236_s20 }
  0x57   : > { %631 = vmatprep.subr.mxu1 %v370_v3  ;;  %626 = vmatprep.subr.mxu0 %v271_v1  ;;  %v366_v8 = vld [vmem:[#allocation7 + $0x58] sm:$0xff]  ;;  %v365_v9 = vld [vmem:[#allocation7 + $0x50] sm:$0xff]  ;;  %v364_v10 = vld [vmem:[#allocation7 + $0x48] sm:$0xff]  ;;  %s833_s18 = scalar_lea.vmem %s1111_s8, 256  ;;  %p1195_p11 = scmp.ne.s32.totalorder %s1182_s25, 0 }
  0x58   : > { %632 = vmatpush3.msra.mxu1 %v370_v3  ;;  %627 = vmatpush3.msra.mxu0 %v271_v1  ;;  %v363_v11 = vld [vmem:[#allocation7 + $0x40] sm:$0xff]  ;;  %v362_v12 = vld [vmem:[#allocation7 + $0x38] sm:$0xff]  ;;  %v361_v13 = vld [vmem:[#allocation7 + $0x30] sm:$0xff]  ;;  %p834_p6 = scmp.ne.s32.totalorder %s1111_s8, %s833_s18  ;;  %s928_s14 = smov [#allocation8]  }
  0x59   : > { %633 = vmatprep.subr.mxu1 %v369_v4  ;;  %629 = vmatmul.mubr.msk.f32.vlgmr.msra.gmra.mxu0 %vm273_vm0, %v270_v5  ;;  %v360_v14 = vld [vmem:[#allocation7 + $0x28] sm:$0xff]  ;;  %v359_v15 = vld [vmem:[#allocation7 + $0x20] sm:$0xff]  ;;  %v358_v16 = vld [vmem:[#allocation7 + $0x18] sm:$0xff]  ;;  %s837_s22 = sshll.u32 %s928_s14, 4  ;;  %s838_s22 = int_to_ptr.vmem [resolvable:$false] %s837_s22 }
  0x5a   : > { %634 = vmatpush3.msra.mxu1 %v369_v4  ;;  %v357_v17 = vld [vmem:[#allocation7 + $0x10] sm:$0xff]  ;;  %v356_v18 = vld [vmem:[#allocation7 + $0x8] sm:$0xff]  ;;  %v355_v19 = vld [vmem:[#allocation7] sm:$0xff]  ;;  %p835_p5 = pnand %p834_p6, %p1195_p11  ;;  %s839_s30 = scalar_lea.vmem %s838_s22, 512 }
  0x5b   : > { %635 = vmatprep.subr.mxu1 %v368_v6  ;;  %v594_v22 = vld [vmem:[%s1169_s3] ss:$0 sm:$0xff]  ;;  %p840_p4 = scmp.lt.s32.totalorder %s1111_s8, %s838_s22  ;;  %p841_p3 = scmp.lt.s32.totalorder %s839_s30, %s833_s18 }
  0x5c   : > { %636 = vmatpush3.msra.mxu1 %v368_v6  ;;  %p836_p1 = pneg %p835_p5 }
  0x5d   : > { %637 = vmatprep.subr.mxu1 %v367_v7  ;;  %p842_p8 = por %p841_p3, %p840_p4 }
  0x5e   : > { %638 = vmatpush3.msra.mxu1 %v367_v7 }
  0x5f   : > { %639 = vmatprep.subr.mxu1 %v366_v8  ;;  %p843_p10 = pnand %p842_p8, %p836_p1 }
  0x60   : > { %640 = vmatpush3.msra.mxu1 %v366_v8 }
  0x61   : > { %641 = vmatprep.subr.mxu1 %v365_v9 }
  0x62   : > { %642 = vmatpush3.msra.mxu1 %v365_v9 }
  0x63   : > { %643 = vmatprep.subr.mxu1 %v364_v10 }
  0x64   : > { %644 = vmatpush3.msra.mxu1 %v364_v10 }
  0x65   : > { %645 = vmatprep.subr.mxu1 %v363_v11 }
  0x66   : > { %646 = vmatpush3.msra.mxu1 %v363_v11 }
  0x67   : > { %647 = vmatprep.subr.mxu1 %v362_v12 }
  0x68   : > { %648 = vmatpush3.msra.mxu1 %v362_v12 }
  0x69   : > { %649 = vmatprep.subr.mxu1 %v361_v13 }
  0x6a   : > { %650 = vmatpush3.msra.mxu1 %v361_v13 }
  0x6b   : > { %651 = vmatprep.subr.mxu1 %v360_v14 }
  0x6c   : > { %652 = vmatpush3.msra.mxu1 %v360_v14 }
  0x6d   : > { %653 = vmatprep.subr.mxu1 %v359_v15 }
  0x6e   : > { %654 = vmatpush3.msra.mxu1 %v359_v15 }
  0x6f   : > { %655 = vmatprep.subr.mxu1 %v358_v16 }
  0x70   : > { %656 = vmatpush3.msra.mxu1 %v358_v16 }
  0x71   : > { %657 = vmatprep.subr.mxu1 %v357_v17 }
  0x72   : > { %658 = vmatpush3.msra.mxu1 %v357_v17 }
  0x73   : > { %659 = vmatprep.subr.mxu1 %v356_v18 }
  0x74   : > { %660 = vmatpush3.msra.mxu1 %v356_v18 }
  0x75   : > { %661 = vmatprep.subr.mxu1 %v355_v19 }
  0x76   : > { %662 = vmatpush3.msra.mxu1 %v355_v19 }
 0x119   : > { %v630_v20 = vpop.f32.mrf.mxu0 }
 0x11b   : > { %v346_v21 = vpop.f32.mrf.mxu0 }
 0x11c   : > { %663 = vmatprep.mubr.f32.mxu1 %v346_v21 }
 0x11d   : > { %664 = vmatmul.mubr.f32.vlgmr.msra.gmra.mxu1 %v630_v20 }
 0x1dd   : > { %v665_v23 = vpop.f32.mrf.mxu1 }
 0x1de   : > { %v450_v24 = vadd.f32 %v665_v23, %v594_v22 }
 0x1df   : > { %v444_v25 = vpop.f32.mrf.mxu1 }
 0x1e0   : > { %454 = vst [vmem:[%s266_s27 + $0x8] sm:$0xff] %v450_v24  ;;  %v445_v26 = vadd.f32 %v594_v22, %v444_v25 }
 0x1e2   : > { %453 = vst [vmem:[%s266_s27] sm:$0xff] %v445_v26 }
 0x1e3   : > { %846 = shalt.err (!%p843_p10)
}
 0x1e4   : > { %s847_s23 = scalar_lea.hbm %s1116_s11, 256  ;;  %s851_s20 = scalar_lea.hbm %s1170_s4, 512 }
 0x1e5   : > { %p848_p13 = scmp.ne.s32.totalorder %s1116_s11, %s847_s23  ;;  %p852_p7 = scmp.lt.s32.totalorder %s1116_s11, %s1170_s4 }
 0x1e6   : > { %p853_p12 = scmp.lt.s32.totalorder %s851_s20, %s847_s23 }
 0x1e7   : > { %p849_p0 = pnand %p848_p13, %p1195_p11 }
 0x1e8   : > { %p854_p2 = por %p853_p12, %p852_p7 }
 0x1e9   : > { %p850_p9 = pneg %p849_p0 }
 0x1eb   : > { %p855_p6 = pnand %p854_p2, %p850_p9 }
 0x1ed   : > { %858 = shalt.err (!%p855_p6)
}
 0x1ee   : > { %s929_s7 = smov 128   ;;  %s930_s21 = smov 8  }
 0x1ef   : > { %676 = dma.vmem_to_hbm [thread:$0]  (%p1195_p11), %s1111_s8, 256, %s1116_s11, %s1120_s13, %s929_s7, %s929_s7, %s930_s21  }
 0x1f0 PF: > { %s1196_s24 = sld [smem:[#allocation13_spill]]  ;;  %s486_s27 = sand.u32 1, %s901_s15  }
 0x1f1   : > { %p1197_p5 = scmp.ne.s32.totalorder %s1183_s26, 0  ;;  %s487_s29 = scalar_lea.sflag [#allocation4], %s486_s27 }
 0x1f6   : > { %p1198_p1 = scmp.ge.s32.totalorder %s1196_s24, 2 }
 0x1f8   : > { %p690_p4 = pnand %p1198_p1, %p1197_p5 }
 0x1fa   : > { %p691_p3 = pneg %p690_p4 }
 0x1fc   : > { %896 = dma.done.wait (%p691_p3), %s487_s29, 256  }
 0x1fd   : > { %898 = vsyncadd (%p691_p3), %s487_s29, 4294967040  ;;  %s21_s20 = sadd.s32 1, %s1196_s24   ;;  %s1199_s15 = smov %s905_s16 }
 0x1fe   : > { %p18_p8 = scmp.ge.s32.totalorder %s21_s20, 4   ;;  %s1200_s16 = smov %s909_s17 }
 0x1ff   : > { %s1201_s17 = smov %s1074_s12  ;;  %s1202_s18 = smov %s917_s19 }
 0x200   : > { %s1203_s19 = smov %s1205_s28  ;;  %20 = sbr.rel (!%p18_p8) target bundleno = 10 (0xa), region = 91 }
 0x205   :  { %492 = vsyncpa [#allocation3], 1 }
 0x206   :  { %494 = vsyncpa [#allocation3 + $0x1], 1 }
 0x207   :  { %495 = vsyncpa [#allocation6], 1 }
 0x208   :  { %497 = vsyncpa [#allocation6 + $0x1], 1 }
 0x209   :  { %498 = vsyncpa [#allocation4], 1 }
 0x20a   :  { %500 = vsyncpa [#allocation4 + $0x1], 1 }

</bundles_post_ra>
